<compile_context>
chip_gen: v5e
topology: v5e:2x2
jax: 0.10.0
libtpu: 0.0.40
codegen_flags: <defaults>
</compile_context>

<pallas_src>
import functools

import jax
import jax.numpy as jnp
from jax.experimental import pallas as pl
from jax.experimental.pallas import tpu as pltpu


def rnn_q_kernel(T,
                 x_ref, w_init_ref, b_init_ref,
                 w_ih_ref, b_rec_ref, w_hh_ref,
                 w_fin_ref, b_fin_ref,
                 out_ref):
    # x_ref:   (B*T, Din)  batch-major flattened input, row index = b*T + t
    # out_ref: (B*T, A)    batch-major flattened action values
    BT = x_ref.shape[0]
    H = w_hh_ref.shape[0]

    # ---- hoisted input-side projection: two large MXU matmuls, all in vregs ----
    #   z   = relu(x @ W_init + b_init)
    #   zih = z @ W_ih + (b_ih + b_hh)        (recurrence biases pre-folded)
    z = jnp.maximum(
        jnp.dot(x_ref[...], w_init_ref[...], preferred_element_type=jnp.float32)
        + b_init_ref[...],
        0.0)
    zih = (jnp.dot(z, w_ih_ref[...], preferred_element_type=jnp.float32)
           + b_rec_ref[...])                                 # (BT, H) in vregs

    # ---- register-resident recurrence (fully unrolled, batch-major) ----
    w_hh = w_hh_ref[...]                                     # hoisted weight load
    # per-row time index: row (b*T + t) -> t   (hoisted out of the loop)
    row_t = jax.lax.broadcasted_iota(jnp.int32, (BT, H), 0) % T
    zero_row = jnp.zeros((1, H), jnp.float32)

    h_all = jnp.zeros((BT, H), jnp.float32)
    for t in range(T):                                       # static T -> unrolled
        # previous hidden state per row: row i <- row i-1; rows at a batch start
        # (time index 0) only matter at t == 0, where their neighbor is still 0.
        h_prev = jnp.concatenate([zero_row, h_all[:BT - 1, :]], axis=0)
        cand = jnp.maximum(
            zih + jnp.dot(h_prev, w_hh, preferred_element_type=jnp.float32),
            0.0)
        # commit only the rows whose time index is t
        h_all = jnp.where(row_t == t, cand, h_all)

    # ---- post-loop: single output projection + single slab store ----
    out_ref[...] = (
        jnp.dot(h_all, w_fin_ref[...], preferred_element_type=jnp.float32)
        + b_fin_ref[...]).astype(out_ref.dtype)


def make_params(key, input_size, hidden_size, action_size):
    """Deterministic parameter init (uniform +/- 1/sqrt(fan_in), PyTorch-style).
    Weights are stored as (in_features, out_features) so the kernel does x @ W."""
    ks = jax.random.split(key, 8)

    def u(k, shape, fan_in):
        bound = 1.0 / jnp.sqrt(fan_in)
        return jax.random.uniform(k, shape, jnp.float32, -bound, bound)

    return dict(
        w_init=u(ks[0], (input_size, hidden_size), input_size),
        b_init=u(ks[1], (1, hidden_size), input_size),
        w_ih=u(ks[2], (hidden_size, hidden_size), hidden_size),
        b_ih=u(ks[3], (1, hidden_size), hidden_size),
        w_hh=u(ks[4], (hidden_size, hidden_size), hidden_size),
        b_hh=u(ks[5], (1, hidden_size), hidden_size),
        w_fin=u(ks[6], (hidden_size, action_size), hidden_size),
        b_fin=u(ks[7], (1, action_size), hidden_size),
    )


@jax.jit
def rnn_q_forward(x, params):
    """Equivalent of RNNQNetwork.forward.  x: (B, T, input_size) or (T, input_size)."""
    if x.ndim < 3:
        x = x[None]                               # unsqueeze(0): batch of 1
    B, T, Din = x.shape
    A = params["w_fin"].shape[1]

    # Reshape-only plumbing: batch-major 2-D slab, no transposes anywhere.
    x_2d = x.reshape(B * T, Din).astype(jnp.float32)

    # Pre-fold the two recurrence biases (added once in the hoisted matmul).
    b_rec = (params["b_ih"] + params["b_hh"]).astype(jnp.float32)

    out_2d = pl.pallas_call(
        functools.partial(rnn_q_kernel, T),
        out_shape=jax.ShapeDtypeStruct((B * T, A), jnp.float32),
        in_specs=[pl.BlockSpec(memory_space=pltpu.MemorySpace.VMEM)] * 8,
        out_specs=pl.BlockSpec(memory_space=pltpu.MemorySpace.VMEM),
    )(x_2d,
      params["w_init"], params["b_init"],
      params["w_ih"], b_rec, params["w_hh"],
      params["w_fin"], params["b_fin"])

    return out_2d.reshape(B, T, A)                # reshape only, no transpose


def rnn_q_forward_ref(x, params):
    """Pure-JAX reference matching the PyTorch forward pass."""
    if x.ndim < 3:
        x = x[None]
    z = jnp.maximum(x @ params["w_init"] + params["b_init"][0], 0.0)
    B, T, H = z.shape
    h = jnp.zeros((B, H), jnp.float32)
    outs = []
    for t in range(T):
        h = jnp.maximum(z[:, t] @ params["w_ih"] + params["b_ih"][0]
                        + h @ params["w_hh"] + params["b_hh"][0], 0.0)
        outs.append(h @ params["w_fin"] + params["b_fin"][0])
    return jnp.stack(outs, axis=1)


if __name__ == "__main__":
    B, T = 2, 8
    INPUT_SIZE, HIDDEN_SIZE, ACTION_SIZE = 16, 32, 4

    key = jax.random.PRNGKey(0)
    k_params, k_x = jax.random.split(key)
    params = make_params(k_params, INPUT_SIZE, HIDDEN_SIZE, ACTION_SIZE)
    x = jax.random.normal(k_x, (B, T, INPUT_SIZE), jnp.float32)

    # Batched (B, T, Din) path.
    out = rnn_q_forward(x, params)
    jax.block_until_ready(out)
    ref = rnn_q_forward_ref(x, params)
    assert out.shape == (B, T, ACTION_SIZE)
    assert jnp.allclose(out, ref, atol=1e-4, rtol=1e-4), "mismatch vs JAX reference"

    # Unbatched (T, Din) path (module's unsqueeze(0) behavior).
    out1 = rnn_q_forward(x[0], params)
    jax.block_until_ready(out1)
    ref1 = rnn_q_forward_ref(x[0], params)
    assert out1.shape == (1, T, ACTION_SIZE)
    assert jnp.allclose(out1, ref1, atol=1e-4, rtol=1e-4), "mismatch (unbatched)"

    print("KERNEL_OK")
</pallas_src>

<mosaic_0001>
module attributes {stable_mosaic.version = 11 : i64} {
  func.func @rnn_q_kernel(%arg0: memref<16x16xf32, #tpu.memory_space<vmem>>, %arg1: memref<16x32xf32, #tpu.memory_space<vmem>>, %arg2: memref<1x32xf32, #tpu.memory_space<vmem>>, %arg3: memref<32x32xf32, #tpu.memory_space<vmem>>, %arg4: memref<1x32xf32, #tpu.memory_space<vmem>>, %arg5: memref<32x32xf32, #tpu.memory_space<vmem>>, %arg6: memref<32x4xf32, #tpu.memory_space<vmem>>, %arg7: memref<1x4xf32, #tpu.memory_space<vmem>>, %arg8: memref<16x4xf32, #tpu.memory_space<vmem>>) attributes {dimension_semantics = [], scalar_prefetch = 0 : i64, scratch_operands = 0 : i64, tpu.core_type = #tpu.core_type<tc>} {
    %c0 = arith.constant 0 : index
    %c0_0 = arith.constant 0 : index
    %0 = vector.load %arg0[%c0, %c0_0] : memref<16x16xf32, #tpu.memory_space<vmem>>, vector<16x16xf32>
    %c0_1 = arith.constant 0 : index
    %c0_2 = arith.constant 0 : index
    %1 = vector.load %arg1[%c0_1, %c0_2] : memref<16x32xf32, #tpu.memory_space<vmem>>, vector<16x32xf32>
    %cst = arith.constant dense<0.000000e+00> : vector<16x32xf32>
    %2 = tpu.matmul %0, %1, %cst {dimension_numbers = #tpu.dot_dimension_numbers<[1], [0], [0], [1], [0, 0, 1, 1], [], []>} : vector<16x16xf32>, vector<16x32xf32>, vector<16x32xf32> -> vector<16x32xf32>
    %c0_3 = arith.constant 0 : index
    %c0_4 = arith.constant 0 : index
    %3 = vector.load %arg2[%c0_3, %c0_4] : memref<1x32xf32, #tpu.memory_space<vmem>>, vector<1x32xf32>
    %4 = vector.broadcast %3 : vector<1x32xf32> to vector<16x32xf32>
    %5 = arith.addf %2, %4 : vector<16x32xf32>
    %cst_5 = arith.constant 0.000000e+00 : f32
    %6 = vector.broadcast %cst_5 : f32 to vector<16x32xf32>
    %7 = arith.maximumf %5, %6 : vector<16x32xf32>
    %c0_6 = arith.constant 0 : index
    %c0_7 = arith.constant 0 : index
    %8 = vector.load %arg3[%c0_6, %c0_7] : memref<32x32xf32, #tpu.memory_space<vmem>>, vector<32x32xf32>
    %cst_8 = arith.constant dense<0.000000e+00> : vector<16x32xf32>
    %9 = tpu.matmul %7, %8, %cst_8 {dimension_numbers = #tpu.dot_dimension_numbers<[1], [0], [0], [1], [0, 0, 1, 1], [], []>} : vector<16x32xf32>, vector<32x32xf32>, vector<16x32xf32> -> vector<16x32xf32>
    %c0_9 = arith.constant 0 : index
    %c0_10 = arith.constant 0 : index
    %10 = vector.load %arg4[%c0_9, %c0_10] : memref<1x32xf32, #tpu.memory_space<vmem>>, vector<1x32xf32>
    %11 = vector.broadcast %10 : vector<1x32xf32> to vector<16x32xf32>
    %12 = arith.addf %9, %11 : vector<16x32xf32>
    %c0_11 = arith.constant 0 : index
    %c0_12 = arith.constant 0 : index
    %13 = vector.load %arg5[%c0_11, %c0_12] : memref<32x32xf32, #tpu.memory_space<vmem>>, vector<32x32xf32>
    %14 = tpu.iota {dimensions = array<i32: 0>} : vector<16x32xi32>
    %c8_i32 = arith.constant 8 : i32
    %c0_i32 = arith.constant 0 : i32
    %15 = arith.cmpi eq, %c8_i32, %c0_i32 : i32
    %c1_i32 = arith.constant 1 : i32
    %16 = arith.select %15, %c1_i32, %c8_i32 : i32
    %17 = vector.broadcast %16 : i32 to vector<16x32xi32>
    %18 = arith.remsi %14, %17 : vector<16x32xi32>
    %c0_i32_13 = arith.constant 0 : i32
    %19 = vector.broadcast %c0_i32_13 : i32 to vector<16x32xi32>
    %20 = arith.cmpi ne, %18, %19 : vector<16x32xi32>
    %c0_i32_14 = arith.constant 0 : i32
    %21 = vector.broadcast %c0_i32_14 : i32 to vector<16x32xi32>
    %22 = arith.cmpi slt, %18, %21 : vector<16x32xi32>
    %c0_i32_15 = arith.constant 0 : i32
    %23 = arith.cmpi slt, %16, %c0_i32_15 : i32
    %24 = vector.broadcast %23 : i1 to vector<16x32xi1>
    %25 = vector.broadcast %24 : vector<16x32xi1> to vector<16x32xi1>
    %26 = arith.xori %22, %25 : vector<16x32xi1>
    %27 = arith.andi %26, %20 : vector<16x32xi1>
    %28 = vector.broadcast %16 : i32 to vector<16x32xi32>
    %29 = arith.addi %18, %28 : vector<16x32xi32>
    %30 = arith.select %27, %29, %18 : vector<16x32xi1>, vector<16x32xi32>
    %cst_16 = arith.constant 0.000000e+00 : f32
    %31 = vector.broadcast %cst_16 : f32 to vector<1x32xf32>
    %cst_17 = arith.constant 0.000000e+00 : f32
    %32 = vector.broadcast %cst_17 : f32 to vector<16x32xf32>
    %33 = vector.extract_strided_slice %32 {offsets = [0, 0], sizes = [15, 32], strides = [1, 1]} : vector<16x32xf32> to vector<15x32xf32>
    %34 = tpu.concatenate %31, %33 in 0 : vector<1x32xf32>, vector<15x32xf32> -> vector<16x32xf32>
    %cst_18 = arith.constant dense<0.000000e+00> : vector<16x32xf32>
    %35 = tpu.matmul %34, %13, %cst_18 {dimension_numbers = #tpu.dot_dimension_numbers<[1], [0], [0], [1], [0, 0, 1, 1], [], []>} : vector<16x32xf32>, vector<32x32xf32>, vector<16x32xf32> -> vector<16x32xf32>
    %36 = arith.addf %12, %35 : vector<16x32xf32>
    %cst_19 = arith.constant 0.000000e+00 : f32
    %37 = vector.broadcast %cst_19 : f32 to vector<16x32xf32>
    %38 = arith.maximumf %36, %37 : vector<16x32xf32>
    %c0_i32_20 = arith.constant 0 : i32
    %39 = vector.broadcast %c0_i32_20 : i32 to vector<16x32xi32>
    %40 = arith.cmpi eq, %30, %39 : vector<16x32xi32>
    %41 = arith.select %40, %38, %32 : vector<16x32xi1>, vector<16x32xf32>
    %42 = vector.extract_strided_slice %41 {offsets = [0, 0], sizes = [15, 32], strides = [1, 1]} : vector<16x32xf32> to vector<15x32xf32>
    %43 = tpu.concatenate %31, %42 in 0 : vector<1x32xf32>, vector<15x32xf32> -> vector<16x32xf32>
    %cst_21 = arith.constant dense<0.000000e+00> : vector<16x32xf32>
    %44 = tpu.matmul %43, %13, %cst_21 {dimension_numbers = #tpu.dot_dimension_numbers<[1], [0], [0], [1], [0, 0, 1, 1], [], []>} : vector<16x32xf32>, vector<32x32xf32>, vector<16x32xf32> -> vector<16x32xf32>
    %45 = arith.addf %12, %44 : vector<16x32xf32>
    %cst_22 = arith.constant 0.000000e+00 : f32
    %46 = vector.broadcast %cst_22 : f32 to vector<16x32xf32>
    %47 = arith.maximumf %45, %46 : vector<16x32xf32>
    %c1_i32_23 = arith.constant 1 : i32
    %48 = vector.broadcast %c1_i32_23 : i32 to vector<16x32xi32>
    %49 = arith.cmpi eq, %30, %48 : vector<16x32xi32>
    %50 = arith.select %49, %47, %41 : vector<16x32xi1>, vector<16x32xf32>
    %51 = vector.extract_strided_slice %50 {offsets = [0, 0], sizes = [15, 32], strides = [1, 1]} : vector<16x32xf32> to vector<15x32xf32>
    %52 = tpu.concatenate %31, %51 in 0 : vector<1x32xf32>, vector<15x32xf32> -> vector<16x32xf32>
    %cst_24 = arith.constant dense<0.000000e+00> : vector<16x32xf32>
    %53 = tpu.matmul %52, %13, %cst_24 {dimension_numbers = #tpu.dot_dimension_numbers<[1], [0], [0], [1], [0, 0, 1, 1], [], []>} : vector<16x32xf32>, vector<32x32xf32>, vector<16x32xf32> -> vector<16x32xf32>
    %54 = arith.addf %12, %53 : vector<16x32xf32>
    %cst_25 = arith.constant 0.000000e+00 : f32
    %55 = vector.broadcast %cst_25 : f32 to vector<16x32xf32>
    %56 = arith.maximumf %54, %55 : vector<16x32xf32>
    %c2_i32 = arith.constant 2 : i32
    %57 = vector.broadcast %c2_i32 : i32 to vector<16x32xi32>
    %58 = arith.cmpi eq, %30, %57 : vector<16x32xi32>
    %59 = arith.select %58, %56, %50 : vector<16x32xi1>, vector<16x32xf32>
    %60 = vector.extract_strided_slice %59 {offsets = [0, 0], sizes = [15, 32], strides = [1, 1]} : vector<16x32xf32> to vector<15x32xf32>
    %61 = tpu.concatenate %31, %60 in 0 : vector<1x32xf32>, vector<15x32xf32> -> vector<16x32xf32>
    %cst_26 = arith.constant dense<0.000000e+00> : vector<16x32xf32>
    %62 = tpu.matmul %61, %13, %cst_26 {dimension_numbers = #tpu.dot_dimension_numbers<[1], [0], [0], [1], [0, 0, 1, 1], [], []>} : vector<16x32xf32>, vector<32x32xf32>, vector<16x32xf32> -> vector<16x32xf32>
    %63 = arith.addf %12, %62 : vector<16x32xf32>
    %cst_27 = arith.constant 0.000000e+00 : f32
    %64 = vector.broadcast %cst_27 : f32 to vector<16x32xf32>
    %65 = arith.maximumf %63, %64 : vector<16x32xf32>
    %c3_i32 = arith.constant 3 : i32
    %66 = vector.broadcast %c3_i32 : i32 to vector<16x32xi32>
    %67 = arith.cmpi eq, %30, %66 : vector<16x32xi32>
    %68 = arith.select %67, %65, %59 : vector<16x32xi1>, vector<16x32xf32>
    %69 = vector.extract_strided_slice %68 {offsets = [0, 0], sizes = [15, 32], strides = [1, 1]} : vector<16x32xf32> to vector<15x32xf32>
    %70 = tpu.concatenate %31, %69 in 0 : vector<1x32xf32>, vector<15x32xf32> -> vector<16x32xf32>
    %cst_28 = arith.constant dense<0.000000e+00> : vector<16x32xf32>
    %71 = tpu.matmul %70, %13, %cst_28 {dimension_numbers = #tpu.dot_dimension_numbers<[1], [0], [0], [1], [0, 0, 1, 1], [], []>} : vector<16x32xf32>, vector<32x32xf32>, vector<16x32xf32> -> vector<16x32xf32>
    %72 = arith.addf %12, %71 : vector<16x32xf32>
    %cst_29 = arith.constant 0.000000e+00 : f32
    %73 = vector.broadcast %cst_29 : f32 to vector<16x32xf32>
    %74 = arith.maximumf %72, %73 : vector<16x32xf32>
    %c4_i32 = arith.constant 4 : i32
    %75 = vector.broadcast %c4_i32 : i32 to vector<16x32xi32>
    %76 = arith.cmpi eq, %30, %75 : vector<16x32xi32>
    %77 = arith.select %76, %74, %68 : vector<16x32xi1>, vector<16x32xf32>
    %78 = vector.extract_strided_slice %77 {offsets = [0, 0], sizes = [15, 32], strides = [1, 1]} : vector<16x32xf32> to vector<15x32xf32>
    %79 = tpu.concatenate %31, %78 in 0 : vector<1x32xf32>, vector<15x32xf32> -> vector<16x32xf32>
    %cst_30 = arith.constant dense<0.000000e+00> : vector<16x32xf32>
    %80 = tpu.matmul %79, %13, %cst_30 {dimension_numbers = #tpu.dot_dimension_numbers<[1], [0], [0], [1], [0, 0, 1, 1], [], []>} : vector<16x32xf32>, vector<32x32xf32>, vector<16x32xf32> -> vector<16x32xf32>
    %81 = arith.addf %12, %80 : vector<16x32xf32>
    %cst_31 = arith.constant 0.000000e+00 : f32
    %82 = vector.broadcast %cst_31 : f32 to vector<16x32xf32>
    %83 = arith.maximumf %81, %82 : vector<16x32xf32>
    %c5_i32 = arith.constant 5 : i32
    %84 = vector.broadcast %c5_i32 : i32 to vector<16x32xi32>
    %85 = arith.cmpi eq, %30, %84 : vector<16x32xi32>
    %86 = arith.select %85, %83, %77 : vector<16x32xi1>, vector<16x32xf32>
    %87 = vector.extract_strided_slice %86 {offsets = [0, 0], sizes = [15, 32], strides = [1, 1]} : vector<16x32xf32> to vector<15x32xf32>
    %88 = tpu.concatenate %31, %87 in 0 : vector<1x32xf32>, vector<15x32xf32> -> vector<16x32xf32>
    %cst_32 = arith.constant dense<0.000000e+00> : vector<16x32xf32>
    %89 = tpu.matmul %88, %13, %cst_32 {dimension_numbers = #tpu.dot_dimension_numbers<[1], [0], [0], [1], [0, 0, 1, 1], [], []>} : vector<16x32xf32>, vector<32x32xf32>, vector<16x32xf32> -> vector<16x32xf32>
    %90 = arith.addf %12, %89 : vector<16x32xf32>
    %cst_33 = arith.constant 0.000000e+00 : f32
    %91 = vector.broadcast %cst_33 : f32 to vector<16x32xf32>
    %92 = arith.maximumf %90, %91 : vector<16x32xf32>
    %c6_i32 = arith.constant 6 : i32
    %93 = vector.broadcast %c6_i32 : i32 to vector<16x32xi32>
    %94 = arith.cmpi eq, %30, %93 : vector<16x32xi32>
    %95 = arith.select %94, %92, %86 : vector<16x32xi1>, vector<16x32xf32>
    %96 = vector.extract_strided_slice %95 {offsets = [0, 0], sizes = [15, 32], strides = [1, 1]} : vector<16x32xf32> to vector<15x32xf32>
    %97 = tpu.concatenate %31, %96 in 0 : vector<1x32xf32>, vector<15x32xf32> -> vector<16x32xf32>
    %cst_34 = arith.constant dense<0.000000e+00> : vector<16x32xf32>
    %98 = tpu.matmul %97, %13, %cst_34 {dimension_numbers = #tpu.dot_dimension_numbers<[1], [0], [0], [1], [0, 0, 1, 1], [], []>} : vector<16x32xf32>, vector<32x32xf32>, vector<16x32xf32> -> vector<16x32xf32>
    %99 = arith.addf %12, %98 : vector<16x32xf32>
    %cst_35 = arith.constant 0.000000e+00 : f32
    %100 = vector.broadcast %cst_35 : f32 to vector<16x32xf32>
    %101 = arith.maximumf %99, %100 : vector<16x32xf32>
    %c7_i32 = arith.constant 7 : i32
    %102 = vector.broadcast %c7_i32 : i32 to vector<16x32xi32>
    %103 = arith.cmpi eq, %30, %102 : vector<16x32xi32>
    %104 = arith.select %103, %101, %95 : vector<16x32xi1>, vector<16x32xf32>
    %c0_36 = arith.constant 0 : index
    %c0_37 = arith.constant 0 : index
    %105 = vector.load %arg6[%c0_36, %c0_37] : memref<32x4xf32, #tpu.memory_space<vmem>>, vector<32x4xf32>
    %cst_38 = arith.constant dense<0.000000e+00> : vector<16x4xf32>
    %106 = tpu.matmul %104, %105, %cst_38 {dimension_numbers = #tpu.dot_dimension_numbers<[1], [0], [0], [1], [0, 0, 1, 1], [], []>} : vector<16x32xf32>, vector<32x4xf32>, vector<16x4xf32> -> vector<16x4xf32>
    %c0_39 = arith.constant 0 : index
    %c0_40 = arith.constant 0 : index
    %107 = vector.load %arg7[%c0_39, %c0_40] : memref<1x4xf32, #tpu.memory_space<vmem>>, vector<1x4xf32>
    %108 = vector.broadcast %107 : vector<1x4xf32> to vector<16x4xf32>
    %109 = arith.addf %106, %108 : vector<16x4xf32>
    %c0_41 = arith.constant 0 : index
    %c0_42 = arith.constant 0 : index
    %110 = vector.load %arg8[%c0_41, %c0_42] : memref<16x4xf32, #tpu.memory_space<vmem>>, vector<16x4xf32>
    tpu.vector_store %arg8[%c0_41, %c0_42], %109 {strides = array<i32>} : memref<16x4xf32, #tpu.memory_space<vmem>>, vector<16x4xf32>,
    return
  }
}

</mosaic_0001>

<bundles_post_ra>
// kernel: rnn_q_forward.1
= control target key start
LH: loop header
LB: loop body
LE: loop exit
PB: predicated region body
PF: predicated region fallthrough
CT: control target
= control target key end

     0   :  { %13 = vsyncpa [#allocation3], 0  ;;  %s849_s0 = inlined_call_operand.hbm [shape: f32[16,16], index: 0, kind: input, shape index: {}]   ;;  %s850_s1 = inlined_call_operand.hbm [shape: f32[16,32], index: 1, kind: input, shape index: {}]   ;;  %s851_s2 = inlined_call_operand.vmem [shape: f32[1,32], index: 2, kind: input, shape index: {}]   ;;  %s852_s3 = inlined_call_operand.vmem [shape: f32[32,32], index: 3, kind: input, shape index: {}]   ;;  %s853_s4 = inlined_call_operand.vmem [shape: f32[1,32], index: 4, kind: input, shape index: {}]   ;;  %s854_s5 = inlined_call_operand.hbm [shape: f32[32,32], index: 5, kind: input, shape index: {}]   ;;  %s855_s6 = inlined_call_operand.vmem [shape: f32[32,4], index: 6, kind: input, shape index: {}]   ;;  %s856_s7 = inlined_call_operand.vmem [shape: f32[1,4], index: 7, kind: input, shape index: {}]   ;;  %s857_s8 = inlined_call_operand.vmem [shape: f32[16,4], index: 8, kind: output, shape index: {}]  }
   0x1   :  { %14 = vsyncpa [#allocation5], 0  ;;  %s32_s29 = sshll.u32 %s850_s1, 4  ;;  %s676_s30 = smov [#allocation4]   ;;  %s33_s29 = int_to_ptr.hbm [resolvable:$true] %s32_s29 }
   0x2   :  { %s34_s9 = sshll.u32 %s676_s30, 4  ;;  %s19_s12 = sshll.u32 %s849_s0, 4  ;;  %s35_s9 = int_to_ptr.vmem [resolvable:$true] %s34_s9  ;;  %s20_s12 = int_to_ptr.hbm [resolvable:$true] %s19_s12 }
   0x3   :  { %s677_s13 = smov 128   ;;  %s678_s14 = smov 8  }
   0x4   :  { %40 = dma.hbm_to_vmem [thread:$0]  %s33_s29, 256, %s35_s9, [#allocation5], %s677_s13, %s677_s13, %s678_s14  }
   0x5   :  { %s679_s15 = smov [#allocation2]   ;;  %s51_s19 = sshll.u32 %s854_s5, 4  ;;  %s52_s19 = int_to_ptr.hbm [resolvable:$true] %s51_s19 }
   0x6   :  { %s21_s16 = sshll.u32 %s679_s15, 4  ;;  %s680_s1 = smov [#allocation6]   ;;  %s22_s16 = int_to_ptr.vmem [resolvable:$true] %s21_s16 }
   0x7   :  { %27 = dma.hbm_to_vmem [thread:$0]  %s20_s12, 256, %s22_s16, [#allocation3], %s677_s13, %s677_s13, %s678_s14  }
   0x8   :  { %s53_s20 = sshll.u32 %s680_s1, 4  ;;  %s54_s20 = int_to_ptr.vmem [resolvable:$true] %s53_s20 }
   0x9   :  { %59 = dma.hbm_to_vmem [thread:$0]  %s52_s19, 512, %s54_s20, [#allocation5], %s677_s13, %s677_s13, %s678_s14  }
   0xa   :  { %672 = dma.done.wait [#allocation3], 256  }
   0xb   :  { %673 = vsyncadd [#allocation3], 4294967040 }
   0xc   :  { %674 = dma.done.wait [#allocation5], 768  }
   0xd   :  { %675 = vsyncadd [#allocation5], 4294966528  ;;  %v79_v0 = vld [vmem:[#allocation4 + $0x8] sm:$0xff]  ;;  %v78_v1 = vld [vmem:[#allocation4] sm:$0xff]  ;;  %vm84_vm0 = vcmask 130048   ;;  %v681_v10 = vmov 0.0   ;;  %v158_v20 = vlaneseq }
   0xe   :  { %105 = vmatpush.msra.mxu0 %v79_v0  ;;  %v76_v2 = vld [vmem:[#allocation2] sm:$0xff]  ;;  %v157_v3 = vld [vmem:[#allocation6 + $0x18] sm:$0xff]  ;;  %v156_v4 = vld [vmem:[#allocation6 + $0x10] sm:$0xff]  ;;  %vm124_vm1 = vcmask 261120   ;;  %vm221_vm3 = vcmask 1040384  }
   0xf   :  { %200 = vmatpush.msra.mxu2 %v157_v3  ;;  %v119_v5 = vld [vmem:[%s852_s3 + $0x18] sm:$0xff]  ;;  %v155_v6 = vld [vmem:[#allocation6 + $0x8] sm:$0xff]  ;;  %v118_v8 = vld [vmem:[%s852_s3 + $0x10] sm:$0xff]  ;;  %v159_v21 = vshrl.u32 %v158_v20, 7 }
  0x10   :  { %106 = vmatpush.msra.mxu0 %v78_v1  ;;  %143 = vmatpush.msra.mxu1 %v119_v5  ;;  %v77_v7 = vld [vmem:[#allocation2 + $0x8] sm:$0xff]  ;;  %v154_v9 = vld [vmem:[#allocation6] sm:$0xff] }
  0x11   :  { %567 = vmatmul.msk.f32.vlgmr.msra.gmra.mxu0 %vm84_vm0, %v76_v2  ;;  %201 = vmatpush.msra.mxu2 %v156_v4  ;;  %v117_v11 = vld [vmem:[%s852_s3 + $0x8] sm:$0xff]  ;;  %v116_v12 = vld [vmem:[%s852_s3] sm:$0xff]  ;;  %v758_v24 = vand.u32 7, %v159_v21  ;;  %v160_v32 = vadd.s32 8, %v159_v21 }
  0x12   :  { %587 = vmatpush.msra.mxu3 %v119_v5  ;;  %287 = vmatpush.msrb.mxu0 %v157_v3  ;;  %v597_v13 = vld [vmem:[%s851_s2] ss:$0 sm:$0xff] }
  0x13   :  { %202 = vmatpush.msra.mxu2 %v155_v6  ;;  %144 = vmatpush.msra.mxu1 %v118_v8  ;;  %v598_v22 = vld [vmem:[%s853_s4] ss:$0 sm:$0xff]  ;;  %vm215_vm2 = vcmp.eq.s32.totalorder %v758_v24, 0  ;;  %v766_v34 = vand.u32 7, %v160_v32  ;;  %vm259_vm5 = vcmp.eq.s32.totalorder %v758_v24, 1  ;;  %vm302_vm7 = vcmp.eq.s32.totalorder %v758_v24, 2 }
  0x14   :  { %288 = vmatpush.msrb.mxu0 %v156_v4  ;;  %588 = vmatpush.msra.mxu3 %v118_v8  ;;  %vm345_vm9 = vcmp.eq.s32.totalorder %v758_v24, 3  ;;  %vm388_vm11 = vcmp.eq.s32.totalorder %v758_v24, 4  ;;  %vm431_vm13 = vcmp.eq.s32.totalorder %v758_v24, 5  ;;  %vm474_vm15 = vcmp.eq.s32.totalorder %v758_v24, 6 }
  0x15   :  { %203 = vmatpush.msra.mxu2 %v154_v9  ;;  %145 = vmatpush.msra.mxu1 %v117_v11  ;;  %vm216_vm4 = vcmp.eq.s32.totalorder %v766_v34, 0  ;;  %vm260_vm6 = vcmp.eq.s32.totalorder %v766_v34, 1  ;;  %vm303_vm8 = vcmp.eq.s32.totalorder %v766_v34, 2  ;;  %vm346_vm10 = vcmp.eq.s32.totalorder %v766_v34, 3 }
  0x16   :  { %289 = vmatpush.msrb.mxu0 %v155_v6  ;;  %204 = vmatmul.f32.vlgmr.msra.gmra.mxu2 %v681_v10  ;;  %vm389_vm12 = vcmp.eq.s32.totalorder %v766_v34, 4  ;;  %vm432_vm14 = vcmp.eq.s32.totalorder %v766_v34, 5 }
  0x17   :  { %589 = vmatpush.msra.mxu3 %v117_v11  ;;  %373 = vmatpush.msrb.mxu2 %v157_v3 }
  0x18   :  { %290 = vmatpush.msrb.mxu0 %v154_v9  ;;  %146 = vmatpush.msra.mxu1 %v116_v12 }
  0x19   :  { %568 = vmatmul.msk.f32.gmra.mxu0 %vm84_vm0, %v77_v7  ;;  %590 = vmatpush.msra.mxu3 %v116_v12  ;;  %vm475_vm0 = vcmp.eq.s32.totalorder %v766_v34, 6 }
  0x1a   :  { %459 = vmatpush.msra.mxu0 %v157_v3  ;;  %330 = vmatpush.msrb.mxu1 %v157_v3 }
  0x1b   :  { %244 = vmatpush.msrb.mxu3 %v157_v3  ;;  %374 = vmatpush.msrb.mxu2 %v156_v4 }
  0x1c   :  { %331 = vmatpush.msrb.mxu1 %v156_v4  ;;  %460 = vmatpush.msra.mxu0 %v156_v4 }
  0x1d   :  { %245 = vmatpush.msrb.mxu3 %v156_v4  ;;  %375 = vmatpush.msrb.mxu2 %v155_v6 }
  0x1e   :  { %207 = vmatmul.f32.gmra.mxu2 %v681_v10  ;;  %332 = vmatpush.msrb.mxu1 %v155_v6 }
  0x1f   :  { %246 = vmatpush.msrb.mxu3 %v155_v6  ;;  %376 = vmatpush.msrb.mxu2 %v154_v9 }
  0x20   :  { %333 = vmatpush.msrb.mxu1 %v154_v9  ;;  %461 = vmatpush.msra.mxu0 %v155_v6 }
  0x21   :  { %247 = vmatpush.msrb.mxu3 %v154_v9 }
  0x22   :  { %462 = vmatpush.msra.mxu0 %v154_v9 }
  0x8e   :  { %v108_v14 = vpop.f32.mrf.mxu0 }
  0x8f   :  { %v109_v15 = vadd.f32 %v597_v13, %v108_v14 }
  0x91   :  { %v114_v16 = vmax.f32 %v109_v15, 0.0 }
  0x93   :  { %569 = vmatmul.msk.f32.vlgmr.msra.gmra.mxu1 %vm124_vm1, %v114_v16 }
  0x94   :  { %502 = vmatpush.msra.mxu1 %v157_v3 }
  0x96   :  { %v111_v17 = vpop.f32.mrf.mxu0  ;;  %503 = vmatpush.msra.mxu1 %v156_v4 }
  0x97   :  { %v112_v18 = vadd.f32 %v597_v13, %v111_v17 }
  0x98   :  { %504 = vmatpush.msra.mxu1 %v155_v6 }
  0x99   :  { %v115_v19 = vmax.f32 %v112_v18, 0.0  ;;  %v205_v25 = vpop.f32.mrf.mxu2 }
  0x9a   :  { %505 = vmatpush.msra.mxu1 %v154_v9 }
  0x9b   :  { %570 = vmatmul.msk.f32.vlgmr.msra.gmra.mxu3 %vm124_vm1, %v115_v19 }
  0x9c   :  { %416 = vmatpush.msra.mxu3 %v157_v3 }
  0x9e   :  { %417 = vmatpush.msra.mxu3 %v156_v4 }
  0xa0   :  { %418 = vmatpush.msra.mxu3 %v155_v6 }
  0xa1   :  { %v208_v35 = vpop.f32.mrf.mxu2 }
  0xa2   :  { %419 = vmatpush.msra.mxu3 %v154_v9 }
 0x110   :  { %v148_v23 = vpop.f32.mrf.mxu1 }
 0x111   :  { %v760_v26 = vadd.f32 %v598_v22, %v148_v23 }
 0x113   :  { %v211_v27 = vadd.f32 %v205_v25, %v760_v26 }
 0x115   :  { %v213_v28 = vmax.f32 %v211_v27, 0.0 }
 0x117   :  { %v217_v29 = vsel %vm215_vm2, %v213_v28, 0.0  ;;  %vm517_vm2 = vcmp.eq.s32.totalorder %v758_v24, 7 }
 0x118   :  { %v222_v30 = vrot.slane %v217_v29, 7 }
 0x11a   :  { %v226_v31 = vsel %vm221_vm3, 0.0, %v222_v30 }
 0x11b   :  { %571 = vmatmul.msk.f32.vlgmr.msrb.gmra.mxu3 %vm124_vm1, %v226_v31 }
 0x11e   :  { %v151_v33 = vpop.f32.mrf.mxu3 }
 0x11f   :  { %v768_v36 = vadd.f32 %v598_v22, %v151_v33 }
 0x121   :  { %v212_v37 = vadd.f32 %v208_v35, %v768_v36 }
 0x123   :  { %v214_v38 = vmax.f32 %v212_v37, 0.0 }
 0x125   :  { %v218_v39 = vsel %vm216_vm4, %v214_v38, 0.0  ;;  %vm558_vm4 = vcmask 31744  }
 0x126   :  { %v223_v40 = vrot.slane %v218_v39, 7 }
 0x128   :  { %v224_v41 = vsel %vm221_vm3, %v222_v30, %v223_v40 }
 0x129   :  { %572 = vmatmul.msk.f32.gmra.mxu3 %vm124_vm1, %v224_v41 }
 0x19e   :  { %v249_v42 = vpop.f32.mrf.mxu3 }
 0x19f   :  { %v255_v43 = vadd.f32 %v249_v42, %v760_v26  ;;  %v524_v42 = vld [vmem:[%s855_s6 + $0x18] sm:$0xff] }
 0x1a0   :  { %547 = vmatpush.msra.mxu2 %v524_v42 }
 0x1a1   :  { %v257_v44 = vmax.f32 %v255_v43, 0.0 }
 0x1a3   :  { %v261_v45 = vsel %vm259_vm5, %v257_v44, %v217_v29 }
 0x1a4   :  { %v265_v46 = vrot.slane %v261_v45, 7 }
 0x1a6   :  { %v269_v47 = vsel %vm221_vm3, 0.0, %v265_v46 }
 0x1a7   :  { %573 = vmatmul.msk.f32.vlgmr.msrb.gmra.mxu0 %vm124_vm1, %v269_v47 }
 0x1ac   :  { %v252_v48 = vpop.f32.mrf.mxu3 }
 0x1ad   :  { %v256_v49 = vadd.f32 %v252_v48, %v768_v36 }
 0x1af   :  { %v258_v50 = vmax.f32 %v256_v49, 0.0 }
 0x1b1   :  { %v262_v51 = vsel %vm260_vm6, %v258_v50, %v218_v39 }
 0x1b2   :  { %v266_v52 = vrot.slane %v262_v51, 7 }
 0x1b4   :  { %v267_v53 = vsel %vm221_vm3, %v265_v46, %v266_v52 }
 0x1b5   :  { %574 = vmatmul.msk.f32.gmra.mxu0 %vm124_vm1, %v267_v53 }
 0x224   :  { %v292_v54 = vpop.f32.mrf.mxu0 }
 0x225   :  { %v298_v55 = vadd.f32 %v292_v54, %v760_v26 }
 0x227   :  { %v300_v56 = vmax.f32 %v298_v55, 0.0  ;;  %v523_v55 = vld [vmem:[%s855_s6 + $0x10] sm:$0xff] }
 0x228   :  { %548 = vmatpush.msra.mxu2 %v523_v55 }
 0x229   :  { %v304_v57 = vsel %vm302_vm7, %v300_v56, %v261_v45  ;;  %v522_v56 = vld [vmem:[%s855_s6 + $0x8] sm:$0xff] }
 0x22a   :  { %v308_v58 = vrot.slane %v304_v57, 7  ;;  %549 = vmatpush.msra.mxu2 %v522_v56 }
 0x22c   :  { %v312_v59 = vsel %vm221_vm3, 0.0, %v308_v58 }
 0x22d   :  { %575 = vmatmul.msk.f32.vlgmr.msrb.gmra.mxu1 %vm124_vm1, %v312_v59 }
 0x232   :  { %v295_v60 = vpop.f32.mrf.mxu0 }
 0x233   :  { %v299_v61 = vadd.f32 %v295_v60, %v768_v36 }
 0x235   :  { %v301_v62 = vmax.f32 %v299_v61, 0.0 }
 0x237   :  { %v305_v63 = vsel %vm303_vm8, %v301_v62, %v262_v51 }
 0x238   :  { %v309_v0 = vrot.slane %v305_v63, 7 }
 0x23a   :  { %v310_v1 = vsel %vm221_vm3, %v308_v58, %v309_v0 }
 0x23b   :  { %576 = vmatmul.msk.f32.gmra.mxu1 %vm124_vm1, %v310_v1 }
 0x2aa   :  { %v335_v2 = vpop.f32.mrf.mxu1 }
 0x2ab   :  { %v341_v3 = vadd.f32 %v335_v2, %v760_v26  ;;  %v599_v2 = vld [vmem:[%s856_s7] ss:$0 sm:$0xff] }
 0x2ad   :  { %v343_v4 = vmax.f32 %v341_v3, 0.0 }
 0x2af   :  { %v347_v5 = vsel %vm345_vm9, %v343_v4, %v304_v57  ;;  %v521_v57 = vld [vmem:[%s855_s6] sm:$0xff] }
 0x2b0   :  { %v351_v6 = vrot.slane %v347_v5, 7  ;;  %550 = vmatpush.msra.mxu2 %v521_v57 }
 0x2b2   :  { %v355_v7 = vsel %vm221_vm3, 0.0, %v351_v6 }
 0x2b3   :  { %577 = vmatmul.msk.f32.vlgmr.msrb.gmra.mxu2 %vm124_vm1, %v355_v7 }
 0x2b8   :  { %v338_v8 = vpop.f32.mrf.mxu1 }
 0x2b9   :  { %v342_v9 = vadd.f32 %v338_v8, %v768_v36 }
 0x2bb   :  { %v344_v10 = vmax.f32 %v342_v9, 0.0 }
 0x2bd   :  { %v348_v11 = vsel %vm346_vm10, %v344_v10, %v305_v63 }
 0x2be   :  { %v352_v12 = vrot.slane %v348_v11, 7 }
 0x2c0   :  { %v353_v13 = vsel %vm221_vm3, %v351_v6, %v352_v12 }
 0x2c1   :  { %578 = vmatmul.msk.f32.gmra.mxu2 %vm124_vm1, %v353_v13 }
 0x336   :  { %v378_v14 = vpop.f32.mrf.mxu2 }
 0x337   :  { %v384_v15 = vadd.f32 %v378_v14, %v760_v26 }
 0x339   :  { %v386_v16 = vmax.f32 %v384_v15, 0.0 }
 0x33b   :  { %v390_v17 = vsel %vm388_vm11, %v386_v16, %v347_v5 }
 0x33c   :  { %v394_v18 = vrot.slane %v390_v17, 7 }
 0x33e   :  { %v398_v19 = vsel %vm221_vm3, 0.0, %v394_v18 }
 0x33f   :  { %579 = vmatmul.msk.f32.vlgmr.msra.gmra.mxu3 %vm124_vm1, %v398_v19 }
 0x344   :  { %v381_v20 = vpop.f32.mrf.mxu2 }
 0x345   :  { %v385_v21 = vadd.f32 %v381_v20, %v768_v36 }
 0x347   :  { %v387_v22 = vmax.f32 %v385_v21, 0.0 }
 0x349   :  { %v391_v23 = vsel %vm389_vm12, %v387_v22, %v348_v11 }
 0x34a   :  { %v395_v25 = vrot.slane %v391_v23, 7 }
 0x34c   :  { %v396_v27 = vsel %vm221_vm3, %v394_v18, %v395_v25 }
 0x34d   :  { %580 = vmatmul.msk.f32.gmra.mxu3 %vm124_vm1, %v396_v27 }
 0x3c2   :  { %v421_v28 = vpop.f32.mrf.mxu3 }
 0x3c3   :  { %v427_v29 = vadd.f32 %v421_v28, %v760_v26 }
 0x3c5   :  { %v429_v30 = vmax.f32 %v427_v29, 0.0 }
 0x3c7   :  { %v433_v31 = vsel %vm431_vm13, %v429_v30, %v390_v17 }
 0x3c8   :  { %v437_v32 = vrot.slane %v433_v31, 7 }
 0x3ca   :  { %v441_v33 = vsel %vm221_vm3, 0.0, %v437_v32 }
 0x3cb   :  { %581 = vmatmul.msk.f32.vlgmr.msra.gmra.mxu0 %vm124_vm1, %v441_v33 }
 0x3d0   :  { %v424_v35 = vpop.f32.mrf.mxu3 }
 0x3d1   :  { %v428_v37 = vadd.f32 %v424_v35, %v768_v36 }
 0x3d3   :  { %v430_v38 = vmax.f32 %v428_v37, 0.0 }
 0x3d5   :  { %v434_v39 = vsel %vm432_vm14, %v430_v38, %v391_v23 }
 0x3d6   :  { %v438_v40 = vrot.slane %v434_v39, 7 }
 0x3d8   :  { %v439_v41 = vsel %vm221_vm3, %v437_v32, %v438_v40 }
 0x3d9   :  { %582 = vmatmul.msk.f32.gmra.mxu0 %vm124_vm1, %v439_v41 }
 0x448   :  { %v464_v43 = vpop.f32.mrf.mxu0 }
 0x449   :  { %v470_v44 = vadd.f32 %v464_v43, %v760_v26 }
 0x44b   :  { %v472_v45 = vmax.f32 %v470_v44, 0.0 }
 0x44d   :  { %v476_v46 = vsel %vm474_vm15, %v472_v45, %v433_v31 }
 0x44e   :  { %v480_v47 = vrot.slane %v476_v46, 7 }
 0x450   :  { %v484_v48 = vsel %vm221_vm3, 0.0, %v480_v47 }
 0x451   :  { %583 = vmatmul.msk.f32.vlgmr.msra.gmra.mxu1 %vm124_vm1, %v484_v48 }
 0x456   :  { %v467_v49 = vpop.f32.mrf.mxu0 }
 0x457   :  { %v471_v50 = vadd.f32 %v467_v49, %v768_v36 }
 0x459   :  { %v473_v51 = vmax.f32 %v471_v50, 0.0 }
 0x45b   :  { %v477_v52 = vsel %vm475_vm0, %v473_v51, %v434_v39 }
 0x45c   :  { %v481_v53 = vrot.slane %v477_v52, 7 }
 0x45e   :  { %v482_v54 = vsel %vm221_vm3, %v480_v47, %v481_v53  ;;  %vm518_vm3 = vcmp.eq.s32.totalorder %v766_v34, 7 }
 0x45f   :  { %584 = vmatmul.msk.f32.gmra.mxu1 %vm124_vm1, %v482_v54 }
 0x4ce   :  { %v507_v58 = vpop.f32.mrf.mxu1 }
 0x4cf   :  { %v513_v59 = vadd.f32 %v507_v58, %v760_v26 }
 0x4d1   :  { %v515_v60 = vmax.f32 %v513_v59, 0.0 }
 0x4d3   :  { %v519_v61 = vsel %vm517_vm2, %v515_v60, %v476_v46 }
 0x4d4   :  { %585 = vmatmul.msk.f32.vlgmr.msra.gmra.mxu2 %vm124_vm1, %v519_v61 }
 0x4dc   :  { %v510_v62 = vpop.f32.mrf.mxu1 }
 0x4dd   :  { %v514_v63 = vadd.f32 %v510_v62, %v768_v36 }
 0x4df   :  { %v516_v0 = vmax.f32 %v514_v63, 0.0 }
 0x4e1   :  { %v520_v1 = vsel %vm518_vm3, %v516_v0, %v477_v52 }
 0x4e2   :  { %586 = vmatmul.msk.f32.gmra.mxu2 %vm124_vm1, %v520_v1 }
 0x557   :  { %v552_v26 = vpop.f32.mrf.mxu2 }
 0x558   :  { %v553_v24 = vadd.f32 %v599_v2, %v552_v26 }
 0x55a   :  { %559 = vst.msk [vmem:[%s857_s8] sm:$0xff] %vm558_vm4, %v553_v24 }
 0x565   :  { %v555_v3 = vpop.f32.mrf.mxu2 }
 0x566   :  { %v556_v4 = vadd.f32 %v599_v2, %v555_v3 }
 0x568   :  { %560 = vst.msk [vmem:[%s857_s8 + $0x8] sm:$0xff] %vm558_vm4, %v556_v4 }
 0x569   :  { %565 = vsyncpa [#allocation3], 1 }
 0x56a   :  { %566 = vsyncpa [#allocation5], 1 }

</bundles_post_ra>
